<compile_context>
chip_gen: v5e
topology: v5e:2x2
jax: 0.10.0
libtpu: 0.0.40
codegen_flags: <defaults>
</compile_context>

<pallas_src>
import functools

import jax
import jax.numpy as jnp
from jax.experimental import pallas as pl
from jax.experimental.pallas import tpu as pltpu


# ----------------------------------------------------------------------------
# Fused Pallas kernel: batched conv-GEMM (+bias+ReLU) -> fc4 (+bias+ReLU) ->
# fc5 (+bias+ReLU).  Everything lives in VMEM / vregs; output is [B, HIDDEN].
# ----------------------------------------------------------------------------
def _fused_forward_kernel(cols_ref, wc_ref, bc_ref, w4_ref, b4_ref,
                          w5_ref, b5_ref, out_ref):
    lp = wc_ref.dtype                        # low-precision MXU operand dtype (bf16)
    bt = cols_ref.shape[0]                   # batch tile
    oc_n = wc_ref.shape[0]                   # conv output channels

    # ---- Conv as ONE batched GEMM: [bt,OC,CKK] @ [bt,CKK,P] -> [bt,OC,P] ----
    wcb = jnp.broadcast_to(wc_ref[...], (bt,) + wc_ref.shape)      # single broadcast
    conv = jnp.einsum("bok,bkp->bop", wcb, cols_ref[...],
                      preferred_element_type=jnp.float32)          # f32 accumulate
    # bias + ReLU + bf16 cast fused, once, over the whole activation.
    conv = jnp.maximum(conv + bc_ref[...], 0.0).astype(lp)         # [bt,OC,P] bf16

    # ---- fc4: OC independent [bt,P] @ [P,HIDDEN] GEMMs (M = bt), then sum ----
    # PyTorch flattens the conv NCHW output channel-major, so with
    # w4 = fc4_w viewed as [OC, P, HIDDEN]:
    #   h4[b, n] = b4[n] + sum_oc conv[b, oc, :] @ w4[oc, :, n]
    parts = [jnp.dot(conv[:, oc, :], w4_ref[oc],
                     preferred_element_type=jnp.float32)
             for oc in range(oc_n)]
    h4 = b4_ref[...] + functools.reduce(jnp.add, parts)            # [bt,HIDDEN] f32
    h4 = jnp.maximum(h4, 0.0).astype(lp)

    # ---- fc5: Linear + ReLU (bf16 operands, f32 accumulate) ----
    h5 = jnp.dot(h4, w5_ref[...],
                 preferred_element_type=jnp.float32) + b5_ref[...]
    out_ref[...] = jnp.maximum(h5, 0.0).astype(out_ref.dtype)


# ----------------------------------------------------------------------------
# Glue: im2col for NCHW input, producing cols = [B, C*KH*KW, OH*OW].
# K ordering (c, kh, kw) matches torch Conv2d weight [OC,C,KH,KW] flatten;
# P ordering (oh, ow) matches the NCHW spatial flatten.  Layout prep only.
# ----------------------------------------------------------------------------
def im2col_nchw_T(x, kh, kw, stride):
    B, C, H, W = x.shape
    OH = (H - kh) // stride + 1
    OW = (W - kw) // stride + 1
    taps = []
    for i in range(kh):
        for j in range(kw):
            taps.append(x[:, :, i:i + stride * OH:stride,
                          j:j + stride * OW:stride])          # [B, C, OH, OW]
    p = jnp.stack(taps, axis=2)                               # [B, C, KH*KW, OH, OW]
    cols = p.reshape(B, C * kh * kw, OH * OW)                 # [B, CKK, P]
    return cols, OH, OW


# ----------------------------------------------------------------------------
# ModelWrapper forward (single pallas_call + XLA-side concat of actions).
# ----------------------------------------------------------------------------
def model_wrapper_forward(params, x, actions=None,
                          action_history_size=10, maxpool_size=1,
                          dot_dtype=jnp.bfloat16):
    if maxpool_size > 1:
        raise NotImplementedError("MaxPool1d path not implemented")  # TODO(synk)

    B = x.shape[0]
    w_conv, b_conv = params["conv_w"], params["conv_b"]       # [OC,C,KH,KW], [OC]
    OC, C, KH, KW = w_conv.shape
    stride = 2

    cols, OH, OW = im2col_nchw_T(x.astype(dot_dtype), KH, KW, stride)  # [B,CKK,P]
    P = OH * OW
    CKK = C * KH * KW
    HIDDEN = params["fc5_w"].shape[1]

    # fc4_w must be packed exactly as PyTorch's [OC*P, HIDDEN] NCHW-flatten
    # (review correctness concern) — guard it.
    assert params["fc4_w"].shape[0] == OC * P, (params["fc4_w"].shape, OC, P)

    # Weight packing — pure views / dtype casts; in a real tracker these are
    # done once at init, not per call.
    wc = w_conv.reshape(OC, CKK).astype(dot_dtype)             # [OC, CKK]   bf16
    bc = b_conv.reshape(1, OC, 1).astype(jnp.float32)          # [1, OC, 1]  f32
    w4 = params["fc4_w"].reshape(OC, P, HIDDEN).astype(dot_dtype)   # [OC, P, HIDDEN]
    b4 = params["fc4_b"].reshape(1, HIDDEN).astype(jnp.float32)     # [1, HIDDEN]
    w5 = params["fc5_w"].astype(dot_dtype)                     # [HIDDEN, HIDDEN]
    b5 = params["fc5_b"].reshape(1, HIDDEN).astype(jnp.float32)     # [1, HIDDEN]

    # Batch grid axis.  bt == B at these tiny shapes (grid of 1); for real
    # ADNet sizes use a smaller bt (multiple of 8) so v7x's 2 TCs split it and
    # cols is pipelined in bounded tiles.
    bt = B
    grid = (pl.cdiv(B, bt),)

    def _resident(a):   # weights: full block, pinned to block 0 (VMEM-resident)
        return pl.BlockSpec(a.shape, lambda i, _nd=a.ndim: (0,) * _nd)

    h5 = pl.pallas_call(
        _fused_forward_kernel,
        out_shape=jax.ShapeDtypeStruct((B, HIDDEN), jnp.float32),
        grid=grid,
        in_specs=[
            pl.BlockSpec((bt, CKK, P), lambda i: (i, 0, 0)),   # cols: tiled over batch
            _resident(wc), _resident(bc), _resident(w4),
            _resident(b4), _resident(w5), _resident(b5),
        ],
        out_specs=pl.BlockSpec((bt, HIDDEN), lambda i: (i, 0)),
        compiler_params=pltpu.CompilerParams(
            dimension_semantics=("parallel",)),
    )(cols, wc, bc, w4, b4, w5, b5)

    # Actions concat moved out of the kernel (lane-dense kernel output).
    if actions is None:
        actions = jnp.zeros((B, action_history_size), dtype=h5.dtype)
    return jnp.concatenate([h5, actions.astype(h5.dtype)], axis=1)


# ----------------------------------------------------------------------------
# Pure-JAX reference.  Operands are rounded to the same bf16 values the kernel
# feeds the MXU; math/accumulation in f32 — so the comparison is tight.
# ----------------------------------------------------------------------------
def reference_forward(params, x, actions, dot_dtype=jnp.bfloat16):
    def rd(a):
        return a.astype(dot_dtype).astype(jnp.float32)

    w_conv, b_conv = params["conv_w"], params["conv_b"]
    y = jax.lax.conv_general_dilated(
        rd(x), rd(w_conv), window_strides=(2, 2), padding="VALID",
        dimension_numbers=("NCHW", "OIHW", "NCHW"))
    y = jnp.maximum(y + b_conv[None, :, None, None], 0.0)
    y = y.reshape(x.shape[0], -1)
    y = jnp.maximum(rd(y) @ rd(params["fc4_w"]) + params["fc4_b"], 0.0)
    y = jnp.maximum(rd(y) @ rd(params["fc5_w"]) + params["fc5_b"], 0.0)
    return jnp.concatenate([y, actions], axis=1)


if __name__ == "__main__":
    # Small synthetic shapes consistent with the module's forward.
    B, C, H, W = 2, 4, 16, 16
    OC, KH, KW = 8, 3, 3
    HIDDEN = 32
    ACTION_HIST = 10

    key = jax.random.PRNGKey(0)
    k0, k1, k2, k3, k4, k5, kx = jax.random.split(key, 7)

    OH = (H - KH) // 2 + 1
    OW = (W - KW) // 2 + 1
    flat_dim = OC * OH * OW

    params = {
        "conv_w": 0.1 * jax.random.normal(k0, (OC, C, KH, KW), jnp.float32),
        "conv_b": 0.1 * jax.random.normal(k1, (OC,), jnp.float32),
        "fc4_w": 0.05 * jax.random.normal(k2, (flat_dim, HIDDEN), jnp.float32),
        "fc4_b": 0.05 * jax.random.normal(k3, (HIDDEN,), jnp.float32),
        "fc5_w": 0.1 * jax.random.normal(k4, (HIDDEN, HIDDEN), jnp.float32),
        "fc5_b": 0.1 * jax.random.normal(k5, (HIDDEN,), jnp.float32),
    }

    x = jax.random.normal(kx, (B, C, H, W), jnp.float32)
    actions = jnp.zeros((B, ACTION_HIST), jnp.float32)   # default in forward

    fwd = jax.jit(functools.partial(model_wrapper_forward,
                                    action_history_size=ACTION_HIST,
                                    maxpool_size=1))
    out = fwd(params, x)                                  # actions=None default
    out = jax.block_until_ready(out)

    ref = reference_forward(params, x, actions)
    assert out.shape == (B, HIDDEN + ACTION_HIST), out.shape
    assert jnp.allclose(out, ref, atol=2e-3, rtol=2e-3), \
        float(jnp.max(jnp.abs(out - ref)))

    print("KERNEL_OK")
</pallas_src>

<mosaic_0001>
module attributes {stable_mosaic.version = 11 : i64} {
  func.func @_fused_forward_kernel(%arg0: i32, %arg1: memref<2x36x49xbf16, #tpu.memory_space<vmem>>, %arg2: memref<8x36xbf16, #tpu.memory_space<vmem>>, %arg3: memref<1x8x1xf32, #tpu.memory_space<vmem>>, %arg4: memref<8x49x32xbf16, #tpu.memory_space<vmem>>, %arg5: memref<1x32xf32, #tpu.memory_space<vmem>>, %arg6: memref<32x32xbf16, #tpu.memory_space<vmem>>, %arg7: memref<1x32xf32, #tpu.memory_space<vmem>>, %arg8: memref<2x32xf32, #tpu.memory_space<vmem>>) attributes {dimension_semantics = [#tpu.dimension_semantics<parallel>], iteration_bounds = array<i64: 1>, scalar_prefetch = 0 : i64, scratch_operands = 0 : i64, tpu.core_type = #tpu.core_type<tc>, window_params = [{transform_indices = @transform_0, window_bounds = array<i64: 2, 36, 49>}, {pipeline_mode = #tpu.pipeline_mode<synchronous>, transform_indices = @transform_1, window_bounds = array<i64: 8, 36>}, {pipeline_mode = #tpu.pipeline_mode<synchronous>, transform_indices = @transform_2, window_bounds = array<i64: 1, 8, 1>}, {pipeline_mode = #tpu.pipeline_mode<synchronous>, transform_indices = @transform_3, window_bounds = array<i64: 8, 49, 32>}, {pipeline_mode = #tpu.pipeline_mode<synchronous>, transform_indices = @transform_4, window_bounds = array<i64: 1, 32>}, {pipeline_mode = #tpu.pipeline_mode<synchronous>, transform_indices = @transform_5, window_bounds = array<i64: 32, 32>}, {pipeline_mode = #tpu.pipeline_mode<synchronous>, transform_indices = @transform_6, window_bounds = array<i64: 1, 32>}, {transform_indices = @transform_7, window_bounds = array<i64: 2, 32>}]} {
    %c0 = arith.constant 0 : index
    %c0_0 = arith.constant 0 : index
    %0 = vector.load %arg2[%c0, %c0_0] : memref<8x36xbf16, #tpu.memory_space<vmem>>, vector<8x36xbf16>
    %1 = vector.shape_cast %0 : vector<8x36xbf16> to vector<1x8x36xbf16>
    %2 = vector.broadcast %1 : vector<1x8x36xbf16> to vector<2x8x36xbf16>
    %c0_1 = arith.constant 0 : index
    %c0_2 = arith.constant 0 : index
    %c0_3 = arith.constant 0 : index
    %3 = vector.load %arg1[%c0_1, %c0_2, %c0_3] : memref<2x36x49xbf16, #tpu.memory_space<vmem>>, vector<2x36x49xbf16>
    "tpu.trace_start"() <{level = 10 : i32, message = "bok,bkp->bop"}> : () -> ()
    %cst = arith.constant dense<0.000000e+00> : vector<2x8x49xf32>
    %4 = tpu.matmul %2, %3, %cst {dimension_numbers = #tpu.dot_dimension_numbers<[2], [1], [1], [2], [0, 0, 0, 1, 1, 2], [0], [0]>} : vector<2x8x36xbf16>, vector<2x36x49xbf16>, vector<2x8x49xf32> -> vector<2x8x49xf32>
    "tpu.trace_stop"() : () -> ()
    %c0_4 = arith.constant 0 : index
    %c0_5 = arith.constant 0 : index
    %c0_6 = arith.constant 0 : index
    %5 = vector.load %arg3[%c0_4, %c0_5, %c0_6] : memref<1x8x1xf32, #tpu.memory_space<vmem>>, vector<1x8x1xf32>
    %6 = vector.broadcast %5 : vector<1x8x1xf32> to vector<2x8x49xf32>
    %7 = arith.addf %4, %6 : vector<2x8x49xf32>
    %cst_7 = arith.constant 0.000000e+00 : f32
    %8 = vector.broadcast %cst_7 : f32 to vector<2x8x49xf32>
    %9 = arith.maximumf %7, %8 : vector<2x8x49xf32>
    %10 = arith.truncf %9 : vector<2x8x49xf32> to vector<2x8x49xbf16>
    %11 = vector.extract_strided_slice %10 {offsets = [0, 0, 0], sizes = [2, 1, 49], strides = [1, 1, 1]} : vector<2x8x49xbf16> to vector<2x1x49xbf16>
    %12 = vector.shape_cast %11 : vector<2x1x49xbf16> to vector<2x49xbf16>
    %c0_8 = arith.constant 0 : index
    %c0_9 = arith.constant 0 : index
    %c0_10 = arith.constant 0 : index
    %13 = vector.load %arg4[%c0_8, %c0_9, %c0_10] : memref<8x49x32xbf16, #tpu.memory_space<vmem>>, vector<1x49x32xbf16>
    %14 = vector.shape_cast %13 : vector<1x49x32xbf16> to vector<49x32xbf16>
    %cst_11 = arith.constant dense<0.000000e+00> : vector<2x32xf32>
    %15 = tpu.matmul %12, %14, %cst_11 {dimension_numbers = #tpu.dot_dimension_numbers<[1], [0], [0], [1], [0, 0, 1, 1], [], []>} : vector<2x49xbf16>, vector<49x32xbf16>, vector<2x32xf32> -> vector<2x32xf32>
    %16 = vector.extract_strided_slice %10 {offsets = [0, 1, 0], sizes = [2, 1, 49], strides = [1, 1, 1]} : vector<2x8x49xbf16> to vector<2x1x49xbf16>
    %17 = vector.shape_cast %16 : vector<2x1x49xbf16> to vector<2x49xbf16>
    %c1 = arith.constant 1 : index
    %c0_12 = arith.constant 0 : index
    %c0_13 = arith.constant 0 : index
    %18 = vector.load %arg4[%c1, %c0_12, %c0_13] : memref<8x49x32xbf16, #tpu.memory_space<vmem>>, vector<1x49x32xbf16>
    %19 = vector.shape_cast %18 : vector<1x49x32xbf16> to vector<49x32xbf16>
    %cst_14 = arith.constant dense<0.000000e+00> : vector<2x32xf32>
    %20 = tpu.matmul %17, %19, %cst_14 {dimension_numbers = #tpu.dot_dimension_numbers<[1], [0], [0], [1], [0, 0, 1, 1], [], []>} : vector<2x49xbf16>, vector<49x32xbf16>, vector<2x32xf32> -> vector<2x32xf32>
    %21 = vector.extract_strided_slice %10 {offsets = [0, 2, 0], sizes = [2, 1, 49], strides = [1, 1, 1]} : vector<2x8x49xbf16> to vector<2x1x49xbf16>
    %22 = vector.shape_cast %21 : vector<2x1x49xbf16> to vector<2x49xbf16>
    %c2 = arith.constant 2 : index
    %c0_15 = arith.constant 0 : index
    %c0_16 = arith.constant 0 : index
    %23 = vector.load %arg4[%c2, %c0_15, %c0_16] : memref<8x49x32xbf16, #tpu.memory_space<vmem>>, vector<1x49x32xbf16>
    %24 = vector.shape_cast %23 : vector<1x49x32xbf16> to vector<49x32xbf16>
    %cst_17 = arith.constant dense<0.000000e+00> : vector<2x32xf32>
    %25 = tpu.matmul %22, %24, %cst_17 {dimension_numbers = #tpu.dot_dimension_numbers<[1], [0], [0], [1], [0, 0, 1, 1], [], []>} : vector<2x49xbf16>, vector<49x32xbf16>, vector<2x32xf32> -> vector<2x32xf32>
    %26 = vector.extract_strided_slice %10 {offsets = [0, 3, 0], sizes = [2, 1, 49], strides = [1, 1, 1]} : vector<2x8x49xbf16> to vector<2x1x49xbf16>
    %27 = vector.shape_cast %26 : vector<2x1x49xbf16> to vector<2x49xbf16>
    %c3 = arith.constant 3 : index
    %c0_18 = arith.constant 0 : index
    %c0_19 = arith.constant 0 : index
    %28 = vector.load %arg4[%c3, %c0_18, %c0_19] : memref<8x49x32xbf16, #tpu.memory_space<vmem>>, vector<1x49x32xbf16>
    %29 = vector.shape_cast %28 : vector<1x49x32xbf16> to vector<49x32xbf16>
    %cst_20 = arith.constant dense<0.000000e+00> : vector<2x32xf32>
    %30 = tpu.matmul %27, %29, %cst_20 {dimension_numbers = #tpu.dot_dimension_numbers<[1], [0], [0], [1], [0, 0, 1, 1], [], []>} : vector<2x49xbf16>, vector<49x32xbf16>, vector<2x32xf32> -> vector<2x32xf32>
    %31 = vector.extract_strided_slice %10 {offsets = [0, 4, 0], sizes = [2, 1, 49], strides = [1, 1, 1]} : vector<2x8x49xbf16> to vector<2x1x49xbf16>
    %32 = vector.shape_cast %31 : vector<2x1x49xbf16> to vector<2x49xbf16>
    %c4 = arith.constant 4 : index
    %c0_21 = arith.constant 0 : index
    %c0_22 = arith.constant 0 : index
    %33 = vector.load %arg4[%c4, %c0_21, %c0_22] : memref<8x49x32xbf16, #tpu.memory_space<vmem>>, vector<1x49x32xbf16>
    %34 = vector.shape_cast %33 : vector<1x49x32xbf16> to vector<49x32xbf16>
    %cst_23 = arith.constant dense<0.000000e+00> : vector<2x32xf32>
    %35 = tpu.matmul %32, %34, %cst_23 {dimension_numbers = #tpu.dot_dimension_numbers<[1], [0], [0], [1], [0, 0, 1, 1], [], []>} : vector<2x49xbf16>, vector<49x32xbf16>, vector<2x32xf32> -> vector<2x32xf32>
    %36 = vector.extract_strided_slice %10 {offsets = [0, 5, 0], sizes = [2, 1, 49], strides = [1, 1, 1]} : vector<2x8x49xbf16> to vector<2x1x49xbf16>
    %37 = vector.shape_cast %36 : vector<2x1x49xbf16> to vector<2x49xbf16>
    %c5 = arith.constant 5 : index
    %c0_24 = arith.constant 0 : index
    %c0_25 = arith.constant 0 : index
    %38 = vector.load %arg4[%c5, %c0_24, %c0_25] : memref<8x49x32xbf16, #tpu.memory_space<vmem>>, vector<1x49x32xbf16>
    %39 = vector.shape_cast %38 : vector<1x49x32xbf16> to vector<49x32xbf16>
    %cst_26 = arith.constant dense<0.000000e+00> : vector<2x32xf32>
    %40 = tpu.matmul %37, %39, %cst_26 {dimension_numbers = #tpu.dot_dimension_numbers<[1], [0], [0], [1], [0, 0, 1, 1], [], []>} : vector<2x49xbf16>, vector<49x32xbf16>, vector<2x32xf32> -> vector<2x32xf32>
    %41 = vector.extract_strided_slice %10 {offsets = [0, 6, 0], sizes = [2, 1, 49], strides = [1, 1, 1]} : vector<2x8x49xbf16> to vector<2x1x49xbf16>
    %42 = vector.shape_cast %41 : vector<2x1x49xbf16> to vector<2x49xbf16>
    %c6 = arith.constant 6 : index
    %c0_27 = arith.constant 0 : index
    %c0_28 = arith.constant 0 : index
    %43 = vector.load %arg4[%c6, %c0_27, %c0_28] : memref<8x49x32xbf16, #tpu.memory_space<vmem>>, vector<1x49x32xbf16>
    %44 = vector.shape_cast %43 : vector<1x49x32xbf16> to vector<49x32xbf16>
    %cst_29 = arith.constant dense<0.000000e+00> : vector<2x32xf32>
    %45 = tpu.matmul %42, %44, %cst_29 {dimension_numbers = #tpu.dot_dimension_numbers<[1], [0], [0], [1], [0, 0, 1, 1], [], []>} : vector<2x49xbf16>, vector<49x32xbf16>, vector<2x32xf32> -> vector<2x32xf32>
    %46 = vector.extract_strided_slice %10 {offsets = [0, 7, 0], sizes = [2, 1, 49], strides = [1, 1, 1]} : vector<2x8x49xbf16> to vector<2x1x49xbf16>
    %47 = vector.shape_cast %46 : vector<2x1x49xbf16> to vector<2x49xbf16>
    %c7 = arith.constant 7 : index
    %c0_30 = arith.constant 0 : index
    %c0_31 = arith.constant 0 : index
    %48 = vector.load %arg4[%c7, %c0_30, %c0_31] : memref<8x49x32xbf16, #tpu.memory_space<vmem>>, vector<1x49x32xbf16>
    %49 = vector.shape_cast %48 : vector<1x49x32xbf16> to vector<49x32xbf16>
    %cst_32 = arith.constant dense<0.000000e+00> : vector<2x32xf32>
    %50 = tpu.matmul %47, %49, %cst_32 {dimension_numbers = #tpu.dot_dimension_numbers<[1], [0], [0], [1], [0, 0, 1, 1], [], []>} : vector<2x49xbf16>, vector<49x32xbf16>, vector<2x32xf32> -> vector<2x32xf32>
    %c0_33 = arith.constant 0 : index
    %c0_34 = arith.constant 0 : index
    %51 = vector.load %arg5[%c0_33, %c0_34] : memref<1x32xf32, #tpu.memory_space<vmem>>, vector<1x32xf32>
    %52 = arith.addf %15, %20 : vector<2x32xf32>
    %53 = arith.addf %52, %25 : vector<2x32xf32>
    %54 = arith.addf %53, %30 : vector<2x32xf32>
    %55 = arith.addf %54, %35 : vector<2x32xf32>
    %56 = arith.addf %55, %40 : vector<2x32xf32>
    %57 = arith.addf %56, %45 : vector<2x32xf32>
    %58 = arith.addf %57, %50 : vector<2x32xf32>
    %59 = vector.broadcast %51 : vector<1x32xf32> to vector<2x32xf32>
    %60 = arith.addf %59, %58 : vector<2x32xf32>
    %cst_35 = arith.constant 0.000000e+00 : f32
    %61 = vector.broadcast %cst_35 : f32 to vector<2x32xf32>
    %62 = arith.maximumf %60, %61 : vector<2x32xf32>
    %63 = arith.truncf %62 : vector<2x32xf32> to vector<2x32xbf16>
    %c0_36 = arith.constant 0 : index
    %c0_37 = arith.constant 0 : index
    %64 = vector.load %arg6[%c0_36, %c0_37] : memref<32x32xbf16, #tpu.memory_space<vmem>>, vector<32x32xbf16>
    %cst_38 = arith.constant dense<0.000000e+00> : vector<2x32xf32>
    %65 = tpu.matmul %63, %64, %cst_38 {dimension_numbers = #tpu.dot_dimension_numbers<[1], [0], [0], [1], [0, 0, 1, 1], [], []>} : vector<2x32xbf16>, vector<32x32xbf16>, vector<2x32xf32> -> vector<2x32xf32>
    %c0_39 = arith.constant 0 : index
    %c0_40 = arith.constant 0 : index
    %66 = vector.load %arg7[%c0_39, %c0_40] : memref<1x32xf32, #tpu.memory_space<vmem>>, vector<1x32xf32>
    %67 = vector.broadcast %66 : vector<1x32xf32> to vector<2x32xf32>
    %68 = arith.addf %65, %67 : vector<2x32xf32>
    %cst_41 = arith.constant 0.000000e+00 : f32
    %69 = vector.broadcast %cst_41 : f32 to vector<2x32xf32>
    %70 = arith.maximumf %68, %69 : vector<2x32xf32>
    %c0_42 = arith.constant 0 : index
    %c0_43 = arith.constant 0 : index
    %71 = vector.load %arg8[%c0_42, %c0_43] : memref<2x32xf32, #tpu.memory_space<vmem>>, vector<2x32xf32>
    tpu.vector_store %arg8[%c0_42, %c0_43], %70 {strides = array<i32>} : memref<2x32xf32, #tpu.memory_space<vmem>>, vector<2x32xf32>,
    return
  }
  func.func @transform_0(%arg0: i32) -> (i32, i32, i32) {
    %c0_i32 = arith.constant 0 : i32
    %c0_i32_0 = arith.constant 0 : i32
    %c0_i32_1 = arith.constant 0 : i32
    return %arg0, %c0_i32, %c0_i32_0 : i32, i32, i32
  }
  func.func @transform_1(%arg0: i32) -> (i32, i32) {
    %c0_i32 = arith.constant 0 : i32
    %c0_i32_0 = arith.constant 0 : i32
    %c0_i32_1 = arith.constant 0 : i32
    return %c0_i32, %c0_i32_0 : i32, i32
  }
  func.func @transform_2(%arg0: i32) -> (i32, i32, i32) {
    %c0_i32 = arith.constant 0 : i32
    %c0_i32_0 = arith.constant 0 : i32
    %c0_i32_1 = arith.constant 0 : i32
    %c0_i32_2 = arith.constant 0 : i32
    return %c0_i32, %c0_i32_0, %c0_i32_1 : i32, i32, i32
  }
  func.func @transform_3(%arg0: i32) -> (i32, i32, i32) {
    %c0_i32 = arith.constant 0 : i32
    %c0_i32_0 = arith.constant 0 : i32
    %c0_i32_1 = arith.constant 0 : i32
    %c0_i32_2 = arith.constant 0 : i32
    return %c0_i32, %c0_i32_0, %c0_i32_1 : i32, i32, i32
  }
  func.func @transform_4(%arg0: i32) -> (i32, i32) {
    %c0_i32 = arith.constant 0 : i32
    %c0_i32_0 = arith.constant 0 : i32
    %c0_i32_1 = arith.constant 0 : i32
    return %c0_i32, %c0_i32_0 : i32, i32
  }
  func.func @transform_5(%arg0: i32) -> (i32, i32) {
    %c0_i32 = arith.constant 0 : i32
    %c0_i32_0 = arith.constant 0 : i32
    %c0_i32_1 = arith.constant 0 : i32
    return %c0_i32, %c0_i32_0 : i32, i32
  }
  func.func @transform_6(%arg0: i32) -> (i32, i32) {
    %c0_i32 = arith.constant 0 : i32
    %c0_i32_0 = arith.constant 0 : i32
    %c0_i32_1 = arith.constant 0 : i32
    return %c0_i32, %c0_i32_0 : i32, i32
  }
  func.func @transform_7(%arg0: i32) -> (i32, i32) {
    %c0_i32 = arith.constant 0 : i32
    %c0_i32_0 = arith.constant 0 : i32
    return %arg0, %c0_i32 : i32, i32
  }
}

</mosaic_0001>

<bundles_post_ra>
// kernel: model_wrapper_forward.1
= control target key start
LH: loop header
LB: loop body
LE: loop exit
PB: predicated region body
PF: predicated region fallthrough
CT: control target
= control target key end

     0   :  { %v814_v2 = vmov 0   ;;  %vm63_vm0 = vcmask 1041408   ;;  %vm59_vm1 = vcmask 293888   ;;  %vm167_vm2 = vcmask 1040384   ;;  %s1006_s0 = inlined_call_operand.vmem [shape: bf16[2,36,49], index: 0, kind: input, shape index: {}]   ;;  %s1007_s2 = inlined_call_operand.vmem [shape: f32[1,8,1], index: 2, kind: input, shape index: {}]   ;;  %s1008_s1 = inlined_call_operand.vmem [shape: bf16[8,36], index: 1, kind: input, shape index: {}]   ;;  %s1009_s3 = inlined_call_operand.vmem [shape: bf16[8,49,32], index: 3, kind: input, shape index: {}]   ;;  %s1010_s4 = inlined_call_operand.vmem [shape: f32[1,32], index: 4, kind: input, shape index: {}]   ;;  %s1011_s6 = inlined_call_operand.vmem [shape: f32[1,32], index: 6, kind: input, shape index: {}]   ;;  %s1012_s5 = inlined_call_operand.vmem [shape: bf16[32,32], index: 5, kind: input, shape index: {}]   ;;  %s1013_s7 = inlined_call_operand.vmem [shape: f32[2,32], index: 7, kind: output, shape index: {}]  }
   0x1   :  { %v32_v0 = vld [vmem:[%s1006_s0 + $0x10] sm:$0x3]  ;;  %v37_v1 = vld [vmem:[%s1006_s0 + $0x24] sm:$0x3]  ;;  %811 = vset.pattern.permute.xlu0 %v814_v2  ;;  %v781_v10 = vld [vmem:[%s1006_s0 + $0x8] sm:$0xff]  ;;  %v169_v22 = vsel %vm167_vm2, 65535, %v814_v2 }
   0x2   :  { %v53_v3 = vunpack.c.l.b16 %v32_v0  ;;  %v89_v4 = vunpack.c.l.b16 %v37_v1  ;;  %v38_v5 = vld [vmem:[%s1007_s2] sm:$0xff]  ;;  %v782_v13 = vld [vmem:[%s1006_s0 + $0x14] sm:$0xff]  ;;  %v684_v15 = vld [vmem:[%s1009_s3 + $0x88] sm:$0x1]  ;;  %vm139_vm3 = vcmask 1041409   ;;  %vm163_vm4 = vcmask 400384  }
   0x3   :  { %41 = vperm.xlu0 %811, %v38_v5   ;;  %v783_v11 = vld [vmem:[%s1006_s0 + $0x1c] sm:$0xff]  ;;  %v622_v16 = vld [vmem:[%s1009_s3 + $0x34] sm:$0x1]  ;;  %v644_v17 = vld [vmem:[%s1009_s3 + $0x50] sm:$0x1]  ;;  %v315_v18 = vunpack.c.l.b16 %v684_v15  ;;  %vm574_vm5 = vcmask 261120  }
   0x4   :  { %v56_v6 = vpack.c.b16 %v53_v3, %v53_v3  ;;  %v92_v7 = vpack.c.b16 %v89_v4, %v89_v4  ;;  %v780_v12 = vld [vmem:[%s1006_s0] sm:$0xff]  ;;  %v155_v19 = vunpack.c.l.b16 %v622_v16  ;;  %v211_v20 = vunpack.c.l.b16 %v644_v17  ;;  %v664_v21 = vld [vmem:[%s1009_s3 + $0x6c] sm:$0x1]  ;;  %v797_v36 = vld [vmem:[%s1009_s3 + $0x78] sm:$0xff] }
   0x5   :  { %v27_v14 = vld [vmem:[%s1008_s1] sm:$0xf]  ;;  %v263_v23 = vunpack.c.l.b16 %v664_v21  ;;  %v319_v24 = vpack.c.b16 %v315_v18, %v315_v18  ;;  %v789_v33 = vld [vmem:[%s1009_s3 + $0x2c] sm:$0xff]  ;;  %v795_v35 = vld [vmem:[%s1009_s3 + $0x64] sm:$0xff]  ;;  %vm592_vm6 = vcmask 254976  }
   0x6   :  { %v65_v8 = vsel %vm63_vm0, %v56_v6, 0  ;;  %v96_v9 = vsel %vm63_vm0, %v92_v7, 0  ;;  %v159_v25 = vpack.c.b16 %v155_v19, %v155_v19  ;;  %v215_v26 = vpack.c.b16 %v211_v20, %v211_v20  ;;  %v798_v32 = vld [vmem:[%s1009_s3 + $0x80] sm:$0xff]  ;;  %v792_v34 = vld [vmem:[%s1009_s3 + $0x48] sm:$0xff]  ;;  %v796_v40 = vld [vmem:[%s1009_s3 + $0x70] sm:$0xff] }
   0x7   :  { %72 = vmatpush.bf16.msra.mxu0 %v65_v8  ;;  %103 = vmatpush.bf16.msra.mxu1 %v96_v9  ;;  %v267_v27 = vpack.c.b16 %v263_v23, %v263_v23  ;;  %v327_v28 = vand.u32 %v319_v24, %v169_v22  ;;  %v788_v37 = vld [vmem:[%s1009_s3 + $0x24] sm:$0xff]  ;;  %v794_v39 = vld [vmem:[%s1009_s3 + $0x5c] sm:$0xff]  ;;  %v793_v43 = vld [vmem:[%s1009_s3 + $0x54] sm:$0xff] }
   0x8   :  { %v171_v29 = vand.u32 %v169_v22, %v159_v25  ;;  %v223_v30 = vand.u32 %v215_v26, %v169_v22  ;;  %v791_v38 = vld [vmem:[%s1009_s3 + $0x40] sm:$0xff]  ;;  %v790_v42 = vld [vmem:[%s1009_s3 + $0x38] sm:$0xff]  ;;  %v786_v60 = vld [vmem:[%s1009_s3 + $0x10] sm:$0xff] }
   0x9   :  { %v275_v31 = vand.u32 %v267_v27, %v169_v22  ;;  %v787_v41 = vld [vmem:[%s1009_s3 + $0x1c] sm:$0xff]  ;;  %v121_v44 = vld [vmem:[%s1009_s3 + $0x18] sm:$0x1]  ;;  %v704_v45 = vld [vmem:[%s1009_s3 + $0xa4] sm:$0x1] }
   0xa   :  { %177 = vmatpush.bf16.msra.mxu2 %v171_v29  ;;  %229 = vmatpush.bf16.msra.mxu3 %v223_v30  ;;  %v515_v46 = vunpack.c.l.b16 %v121_v44  ;;  %v367_v47 = vunpack.c.l.b16 %v704_v45  ;;  %v724_v48 = vld [vmem:[%s1009_s3 + $0xc0] sm:$0x1]  ;;  %v744_v49 = vld [vmem:[%s1009_s3 + $0xdc] sm:$0x1]  ;;  %v807_v63 = vld [vmem:[%s1009_s3 + $0xd4] sm:$0xff] }
   0xb   :  { %73 = vmatpush.bf16.msra.mxu0 %v781_v10  ;;  %104 = vmatpush.bf16.msra.mxu1 %v783_v11  ;;  %v419_v50 = vunpack.c.l.b16 %v724_v48  ;;  %v471_v51 = vunpack.c.l.b16 %v744_v49  ;;  %v801_v61 = vld [vmem:[%s1009_s3 + $0x9c] sm:$0xff]  ;;  %v785_v0 = vld [vmem:[%s1009_s3 + $0x8] sm:$0xff]  ;;  %v800_v1 = vld [vmem:[%s1009_s3 + $0x94] sm:$0xff] }
   0xc   :  { %v519_v52 = vpack.c.b16 %v515_v46, %v515_v46  ;;  %v371_v53 = vpack.c.b16 %v367_v47, %v367_v47  ;;  %v804_v62 = vld [vmem:[%s1009_s3 + $0xb8] sm:$0xff]  ;;  %v803_v2 = vld [vmem:[%s1009_s3 + $0xb0] sm:$0xff]  ;;  %v784_v4 = vld [vmem:[%s1009_s3] sm:$0xff] }
   0xd   :  { %v423_v54 = vpack.c.b16 %v419_v50, %v419_v50  ;;  %v475_v55 = vpack.c.b16 %v471_v51, %v471_v51  ;;  %v806_v3 = vld [vmem:[%s1009_s3 + $0xcc] sm:$0xff]  ;;  %v805_v7 = vld [vmem:[%s1009_s3 + $0xc4] sm:$0xff] }
   0xe   :  { %178 = vmatpush.bf16.msra.mxu2 %v789_v33  ;;  %230 = vmatpush.bf16.msra.mxu3 %v792_v34  ;;  %v527_v56 = vand.u32 %v519_v52, %v169_v22  ;;  %v379_v57 = vand.u32 %v371_v53, %v169_v22  ;;  %v799_v5 = vld [vmem:[%s1009_s3 + $0x8c] sm:$0xff] }
   0xf   :  { %74 = vmatpush.bf16.msra.mxu0 %v780_v12  ;;  %105 = vmatpush.bf16.msra.mxu1 %v782_v13  ;;  %v431_v58 = vand.u32 %v423_v54, %v169_v22  ;;  %v483_v59 = vand.u32 %v475_v55, %v169_v22  ;;  %v802_v6 = vld [vmem:[%s1009_s3 + $0xa8] sm:$0xff] }
  0x10   :  { %v809_v53 = vld [vmem:[%s1012_s5 + $0x8] sm:$0xff] }
  0x12   :  { %606 = vmatmul.msk.bf16.vlgmr.msra.gmra.mxu0 %vm59_vm1, %v27_v14  ;;  %615 = vmatmul.msk.bf16.vlgmr.msra.gmra.mxu1 %vm59_vm1, %v27_v14 }
  0x13   :  { %333 = vmatpush.bf16.msrb.mxu1 %v327_v28  ;;  %281 = vmatpush.bf16.msrb.mxu0 %v275_v31 }
  0x14   :  { %179 = vmatpush.bf16.msra.mxu2 %v788_v37  ;;  %231 = vmatpush.bf16.msra.mxu3 %v791_v38 }
  0x17   :  { %334 = vmatpush.bf16.msrb.mxu1 %v798_v32  ;;  %282 = vmatpush.bf16.msrb.mxu0 %v795_v35 }
  0x18   :  { %180 = vmatpush.bf16.msra.mxu2 %v787_v41  ;;  %232 = vmatpush.bf16.msra.mxu3 %v790_v42 }
  0x1b   :  { %335 = vmatpush.bf16.msrb.mxu1 %v797_v36  ;;  %283 = vmatpush.bf16.msrb.mxu0 %v794_v39 }
  0x1c   :  { %385 = vmatpush.bf16.msrb.mxu2 %v379_v57  ;;  %437 = vmatpush.bf16.msrb.mxu3 %v431_v58 }
  0x1f   :  { %336 = vmatpush.bf16.msrb.mxu1 %v796_v40  ;;  %284 = vmatpush.bf16.msrb.mxu0 %v793_v43 }
  0x20   :  { %386 = vmatpush.bf16.msrb.mxu2 %v801_v61  ;;  %438 = vmatpush.bf16.msrb.mxu3 %v804_v62 }
  0x23   :  { %533 = vmatpush.bf16.msra.mxu1 %v527_v56  ;;  %489 = vmatpush.bf16.msra.mxu0 %v483_v59  ;;  %v808_v56 = vld [vmem:[%s1012_s5] sm:$0xff] }
  0x24   :  { %387 = vmatpush.bf16.msrb.mxu2 %v800_v1  ;;  %439 = vmatpush.bf16.msrb.mxu3 %v803_v2 }
  0x27   :  { %534 = vmatpush.bf16.msra.mxu1 %v786_v60  ;;  %490 = vmatpush.bf16.msra.mxu0 %v807_v63 }
  0x28   :  { %388 = vmatpush.bf16.msrb.mxu2 %v799_v5  ;;  %440 = vmatpush.bf16.msrb.mxu3 %v802_v6 }
  0x2b   :  { %535 = vmatpush.bf16.msra.mxu1 %v785_v0  ;;  %491 = vmatpush.bf16.msra.mxu0 %v806_v3 }
  0x2f   :  { %536 = vmatpush.bf16.msra.mxu1 %v784_v4  ;;  %492 = vmatpush.bf16.msra.mxu0 %v805_v7 }
  0x75   :  { %v42_v8 = vpop.permute.xlu0 %41 }
  0x8f   :  { %v76_v9 = vpop.f32.mrf.mxu0  ;;  %v107_v10 = vpop.f32.mrf.mxu1 }
  0x90   :  { %v77_v11 = vadd.f32 %v76_v9, %v42_v8  ;;  %v108_v12 = vadd.f32 %v107_v10, %v42_v8 }
  0x92   :  { %v111_v13 = vmax.f32 %v77_v11, 0.0  ;;  %v112_v14 = vmax.f32 %v108_v12, 0.0  ;;  %v812_v11 = vld [vmem:[%s1010_s4] ss:$0 sm:$0xff] }
  0x94   :  { %v113_v15 = vpack.c.bf16 %v111_v13, %v111_v13  ;;  %v114_v16 = vpack.c.bf16 %v112_v14, %v112_v14 }
  0x96   :  { %v132_v17 = vunpack.c.l.b16 %v113_v15  ;;  %v133_v18 = vunpack.c.l.b16 %v114_v16 }
  0x97   :  { %v78_v19 = vpop.f32.mrf.mxu0  ;;  %v109_v20 = vpop.f32.mrf.mxu1 }
  0x98   :  { %v623_v21 = vunpack.i.l.s16 %v132_v17  ;;  %v624_v22 = vunpack.i.l.s16 %v133_v18  ;;  %v813_v18 = vld [vmem:[%s1011_s6] ss:$0 sm:$0xff] }
  0x9a   :  { %v138_v23 = vrot.slane %v623_v21, 1  ;;  %v194_v24 = vrot.slane %v623_v21, 2  ;;  %v195_v25 = vrot.slane %v624_v22, 1  ;;  %v246_v26 = vrot.slane %v623_v21, 3 }
  0x9b   :  { %v247_v27 = vrot.slane %v624_v22, 2  ;;  %v298_v28 = vrot.slane %v623_v21, 4  ;;  %v299_v29 = vrot.slane %v624_v22, 3  ;;  %v350_v38 = vrot.slane %v623_v21, 5 }
  0x9c   :  { %v140_v30 = vsel %vm139_vm3, %v624_v22, %v138_v23  ;;  %v196_v31 = vsel %vm139_vm3, %v195_v25, %v194_v24  ;;  %v351_v39 = vrot.slane %v624_v22, 4  ;;  %v402_v40 = vrot.slane %v623_v21, 6 }
  0x9d   :  { %v141_v32 = vpack.c.b16 %v140_v30, %v140_v30  ;;  %v197_v33 = vpack.c.b16 %v196_v31, %v196_v31  ;;  %v248_v34 = vsel %vm139_vm3, %v247_v27, %v246_v26  ;;  %v300_v35 = vsel %vm139_vm3, %v299_v29, %v298_v28 }
  0x9e   :  { %v249_v36 = vpack.c.b16 %v248_v34, %v248_v34  ;;  %v301_v37 = vpack.c.b16 %v300_v35, %v300_v35  ;;  %v403_v41 = vrot.slane %v624_v22, 5  ;;  %v454_v42 = vrot.slane %v623_v21, 7 }
  0x9f   :  { %637 = vmatmul.msk.bf16.vlgmr.msra.gmra.mxu2 %vm163_vm4, %v141_v32  ;;  %657 = vmatmul.msk.bf16.vlgmr.msra.gmra.mxu3 %vm163_vm4, %v197_v33  ;;  %v455_v43 = vrot.slane %v624_v22, 6  ;;  %v499_v44 = vrot.slane %v624_v22, 7  ;;  %v352_v45 = vsel %vm139_vm3, %v351_v39, %v350_v38 }
  0xa0   :  { %677 = vmatmul.msk.bf16.vlgmr.msrb.gmra.mxu0 %vm163_vm4, %v249_v36  ;;  %697 = vmatmul.msk.bf16.vlgmr.msrb.gmra.mxu1 %vm163_vm4, %v301_v37  ;;  %v404_v46 = vsel %vm139_vm3, %v403_v41, %v402_v40  ;;  %v353_v49 = vpack.c.b16 %v352_v45, %v352_v45 }
  0xa1   :  { %v456_v47 = vsel %vm139_vm3, %v455_v43, %v454_v42  ;;  %v500_v48 = vsel %vm139_vm3, %v499_v44, %v623_v21  ;;  %v405_v50 = vpack.c.b16 %v404_v46, %v404_v46  ;;  %584 = vmatpush.bf16.msra.mxu2 %v809_v53 }
  0xa2   :  { %v457_v51 = vpack.c.b16 %v456_v47, %v456_v47  ;;  %v501_v52 = vpack.c.b16 %v500_v48, %v500_v48 }
  0xa5   :  { %585 = vmatpush.bf16.msra.mxu2 %v808_v56 }
  0xaf   :  { %717 = vmatmul.msk.bf16.vlgmr.msrb.gmra.mxu2 %vm163_vm4, %v353_v49  ;;  %737 = vmatmul.msk.bf16.vlgmr.msrb.gmra.mxu3 %vm163_vm4, %v405_v50 }
  0xb0   :  { %757 = vmatmul.msk.bf16.vlgmr.msra.gmra.mxu0 %vm163_vm4, %v457_v51  ;;  %770 = vmatmul.msk.bf16.vlgmr.msra.gmra.mxu1 %vm163_vm4, %v501_v52 }
 0x11d   :  { %v286_v54 = vpop.f32.mrf.mxu0  ;;  %v338_v55 = vpop.f32.mrf.mxu1 }
 0x122   :  { %v182_v57 = vpop.f32.mrf.mxu2  ;;  %v234_v58 = vpop.f32.mrf.mxu3 }
 0x125   :  { %v288_v59 = vpop.f32.mrf.mxu0  ;;  %v340_v60 = vpop.f32.mrf.mxu1 }
 0x12a   :  { %v184_v61 = vpop.f32.mrf.mxu2  ;;  %v236_v62 = vpop.f32.mrf.mxu3 }
 0x12d   :  { %v494_v63 = vpop.f32.mrf.mxu0  ;;  %v538_v0 = vpop.f32.mrf.mxu1 }
 0x12e   :  { %v539_v1 = vadd.f32 %v538_v0, %v182_v57 }
 0x130   :  { %v542_v2 = vadd.f32 %v539_v1, %v234_v58 }
 0x132   :  { %v390_v3 = vpop.f32.mrf.mxu2  ;;  %v543_v4 = vadd.f32 %v542_v2, %v286_v54  ;;  %v442_v5 = vpop.f32.mrf.mxu3 }
 0x134   :  { %v544_v6 = vadd.f32 %v543_v4, %v338_v55 }
 0x135   :  { %v496_v7 = vpop.f32.mrf.mxu0  ;;  %v540_v8 = vpop.f32.mrf.mxu1 }
 0x136   :  { %v545_v9 = vadd.f32 %v544_v6, %v390_v3 }
 0x138   :  { %v546_v10 = vadd.f32 %v545_v9, %v442_v5 }
 0x13a   :  { %v547_v12 = vadd.f32 %v546_v10, %v494_v63  ;;  %v392_v13 = vpop.f32.mrf.mxu2  ;;  %v444_v14 = vpop.f32.mrf.mxu3 }
 0x13c   :  { %v551_v15 = vadd.f32 %v812_v11, %v547_v12 }
 0x13e   :  { %v552_v16 = vmax.f32 %v551_v15, 0.0 }
 0x140   :  { %v553_v17 = vpack.c.bf16 %v552_v16, %v552_v16 }
 0x142   :  { %779 = vmatmul.msk.bf16.vlgmr.msra.gmra.mxu2 %vm574_vm5, %v553_v17 }
 0x1c5   :  { %v587_v19 = vpop.f32.mrf.mxu2 }
 0x1c6   :  { %v588_v20 = vadd.f32 %v813_v18, %v587_v19 }
 0x1c8   :  { %v591_v21 = vmax.f32 %v588_v20, 0.0 }
 0x1ca   :  { %593 = vst.msk [vmem:[%s1013_s7] sm:$0x3] %vm592_vm6, %v591_v21 }
 0x1cd   :  { %v589_v22 = vpop.f32.mrf.mxu2 }

</bundles_post_ra>
